<compile_context>
chip_gen: v7x
topology: tpu7x:2x2x1
jax: 0.10.0
libtpu: 0.0.40
codegen_flags: <defaults>
</compile_context>

<pallas_src>
import jax
import jax.numpy as jnp
from jax import lax
from jax.experimental import pallas as pl
from jax.experimental.pallas import tpu as pltpu


def _sigmoid(x):
    return 1.0 / (1.0 + jnp.exp(-x))


def _lstm_kernel(x_ref, wih_ref, whh_ref, b_ref, o_ref, gx_ref, h_ref, c_ref):
    # x_ref  : (S, TB, I)   time-major input tile (TB = batch tile)
    # wih_ref: (I, 4H)      W_ih^T
    # whh_ref: (H, 4H)      W_hh^T
    # b_ref  : (1, 4H)      b_ih + b_hh
    # o_ref  : (S, TB, H)   time-major output tile
    # gx_ref : (S, TB, 4H)  scratch: precomputed input projections
    # h_ref  : (TB, H)      scratch: hidden state
    # c_ref  : (TB, H)      scratch: cell state
    S, TB, I = x_ref.shape
    H = h_ref.shape[-1]

    # --- 1) one big MXU matmul for all timesteps: (S*TB, I) @ (I, 4H) ------
    x2 = x_ref[...].reshape(S * TB, I)
    gx = jnp.dot(x2, wih_ref[...], preferred_element_type=jnp.float32)
    gx = gx + b_ref[...]
    gx_ref[...] = gx.reshape(S, TB, 4 * H)

    # --- 2) sequential recurrence, state kept in VMEM ----------------------
    h_ref[...] = jnp.zeros_like(h_ref)
    c_ref[...] = jnp.zeros_like(c_ref)

    def step(t, carry):
        g = gx_ref[t] + jnp.dot(
            h_ref[...], whh_ref[...], preferred_element_type=jnp.float32
        )  # (TB, 4H); gate order matches PyTorch LSTM: i, f, g, o
        i_g = _sigmoid(g[:, 0 * H:1 * H])
        f_g = _sigmoid(g[:, 1 * H:2 * H])
        c_g = jnp.tanh(g[:, 2 * H:3 * H])
        o_g = _sigmoid(g[:, 3 * H:4 * H])
        c_new = f_g * c_ref[...] + i_g * c_g
        h_new = o_g * jnp.tanh(c_new)
        c_ref[...] = c_new
        h_ref[...] = h_new
        o_ref[t] = h_new.astype(o_ref.dtype)
        return carry

    lax.fori_loop(0, S, step, 0)


def single_rnn_forward(x, w_ih, w_hh, b_ih, b_hh, *, tile_b: int = 8):
    """SingleRNN('LSTM', input_size, hidden_size).forward.

    x:     (batch, seq, input_size)  float32
    w_ih:  (4*hidden, input_size)    float32  (PyTorch weight_ih_l0)
    w_hh:  (4*hidden, hidden)        float32  (PyTorch weight_hh_l0)
    b_ih:  (4*hidden,)               float32
    b_hh:  (4*hidden,)               float32
    returns (batch, seq, hidden)     float32
    """
    B, S, I = x.shape
    G, H = w_hh.shape[0], w_hh.shape[1]
    assert G == 4 * H and w_ih.shape == (G, I)

    # Time-major layout; pad batch to a sublane-friendly multiple of tile_b.
    x_t = jnp.transpose(x, (1, 0, 2))                     # (S, B, I)
    B_pad = ((B + tile_b - 1) // tile_b) * tile_b
    if B_pad != B:
        x_t = jnp.pad(x_t, ((0, 0), (0, B_pad - B), (0, 0)))

    wih_t = w_ih.T                                        # (I, 4H)
    whh_t = w_hh.T                                        # (H, 4H)
    b = (b_ih + b_hh).reshape(1, G)                       # (1, 4H)

    grid = (B_pad // tile_b,)

    flops = 2 * S * B_pad * G * (I + H)
    transcendentals = 5 * S * B_pad * H
    bytes_accessed = 4 * (S * B_pad * (I + H) + G * (I + H + 1))

    out = pl.pallas_call(
        _lstm_kernel,
        out_shape=jax.ShapeDtypeStruct((S, B_pad, H), jnp.float32),
        grid_spec=pltpu.PrefetchScalarGridSpec(
            num_scalar_prefetch=0,
            grid=grid,
            in_specs=[
                pl.BlockSpec((S, tile_b, I), lambda bt: (0, bt, 0)),
                pl.BlockSpec((I, G), lambda bt: (0, 0)),
                pl.BlockSpec((H, G), lambda bt: (0, 0)),
                pl.BlockSpec((1, G), lambda bt: (0, 0)),
            ],
            out_specs=pl.BlockSpec((S, tile_b, H), lambda bt: (0, bt, 0)),
            scratch_shapes=[
                pltpu.VMEM((S, tile_b, G), jnp.float32),   # gx
                pltpu.VMEM((tile_b, H), jnp.float32),      # h
                pltpu.VMEM((tile_b, H), jnp.float32),      # c
            ],
        ),
        compiler_params=pltpu.CompilerParams(
            dimension_semantics=("parallel",),
        ),
        cost_estimate=pl.CostEstimate(
            flops=flops,
            transcendentals=transcendentals,
            bytes_accessed=bytes_accessed,
        ),
    )(x_t, wih_t, whh_t, b)

    out = out[:, :B, :]                                   # drop batch padding
    return jnp.transpose(out, (1, 0, 2))                  # (B, S, H)


def lstm_reference(x, w_ih, w_hh, b_ih, b_hh):
    """Pure-JAX reference matching torch.nn.LSTM (batch_first, 1 layer, unidir)."""
    B, S, I = x.shape
    H = w_hh.shape[1]
    hi = lax.Precision.HIGHEST

    def cell(carry, x_t):
        h, c = carry
        g = (
            jnp.dot(x_t, w_ih.T, precision=hi)
            + b_ih
            + jnp.dot(h, w_hh.T, precision=hi)
            + b_hh
        )
        i_g = _sigmoid(g[:, 0 * H:1 * H])
        f_g = _sigmoid(g[:, 1 * H:2 * H])
        c_g = jnp.tanh(g[:, 2 * H:3 * H])
        o_g = _sigmoid(g[:, 3 * H:4 * H])
        c = f_g * c + i_g * c_g
        h = o_g * jnp.tanh(c)
        return (h, c), h

    h0 = jnp.zeros((B, H), jnp.float32)
    c0 = jnp.zeros((B, H), jnp.float32)
    (_, _), hs = lax.scan(cell, (h0, c0), jnp.swapaxes(x, 0, 1))
    return jnp.swapaxes(hs, 0, 1)                         # (B, S, H)


if __name__ == "__main__":
    key = jax.random.PRNGKey(0)
    kx, k1, k2, k3, k4 = jax.random.split(key, 5)

    # Small deterministic config: SingleRNN('LSTM', input_size=64, hidden_size=128)
    batch, seq, input_size, hidden_size = 2, 16, 64, 128
    H = hidden_size
    bound = 1.0 / (hidden_size ** 0.5)   # PyTorch RNN default init

    x = jax.random.normal(kx, (batch, seq, input_size), jnp.float32)
    w_ih = jax.random.uniform(k1, (4 * H, input_size), jnp.float32, -bound, bound)
    w_hh = jax.random.uniform(k2, (4 * H, H), jnp.float32, -bound, bound)
    b_ih = jax.random.uniform(k3, (4 * H,), jnp.float32, -bound, bound)
    b_hh = jax.random.uniform(k4, (4 * H,), jnp.float32, -bound, bound)

    out = single_rnn_forward(x, w_ih, w_hh, b_ih, b_hh)
    out = jax.block_until_ready(out)

    ref = lstm_reference(x, w_ih, w_hh, b_ih, b_hh)
    assert out.shape == (batch, seq, hidden_size)
    max_err = float(jnp.max(jnp.abs(out - ref)))
    assert jnp.allclose(out, ref, atol=1e-4, rtol=1e-4), max_err

    print("KERNEL_OK")
</pallas_src>

<mosaic_0001>
module attributes {stable_mosaic.version = 11 : i64} {
  func.func @_lstm_kernel(%arg0: i32, %arg1: memref<16x8x64xf32, #tpu.memory_space<vmem>>, %arg2: memref<64x512xf32, #tpu.memory_space<vmem>>, %arg3: memref<128x512xf32, #tpu.memory_space<vmem>>, %arg4: memref<1x512xf32, #tpu.memory_space<vmem>>, %arg5: memref<16x8x128xf32, #tpu.memory_space<vmem>>, %arg6: memref<16x8x512xf32, #tpu.memory_space<vmem>>, %arg7: memref<8x128xf32, #tpu.memory_space<vmem>>, %arg8: memref<8x128xf32, #tpu.memory_space<vmem>>) attributes {dimension_semantics = [#tpu.dimension_semantics<parallel>], iteration_bounds = array<i64: 1>, scalar_prefetch = 0 : i64, scratch_operands = 3 : i64, tpu.core_type = #tpu.core_type<tc>, window_params = [{transform_indices = @transform_0, window_bounds = array<i64: 16, 8, 64>}, {pipeline_mode = #tpu.pipeline_mode<synchronous>, transform_indices = @transform_1, window_bounds = array<i64: 64, 512>}, {pipeline_mode = #tpu.pipeline_mode<synchronous>, transform_indices = @transform_2, window_bounds = array<i64: 128, 512>}, {pipeline_mode = #tpu.pipeline_mode<synchronous>, transform_indices = @transform_3, window_bounds = array<i64: 1, 512>}, {transform_indices = @transform_4, window_bounds = array<i64: 16, 8, 128>}]} {
    %c0 = arith.constant 0 : index
    %c0_0 = arith.constant 0 : index
    %c0_1 = arith.constant 0 : index
    %0 = vector.load %arg1[%c0, %c0_0, %c0_1] : memref<16x8x64xf32, #tpu.memory_space<vmem>>, vector<16x8x64xf32>
    %1 = vector.shape_cast %0 : vector<16x8x64xf32> to vector<128x64xf32>
    %c0_2 = arith.constant 0 : index
    %c0_3 = arith.constant 0 : index
    %2 = vector.load %arg2[%c0_2, %c0_3] : memref<64x512xf32, #tpu.memory_space<vmem>>, vector<64x512xf32>
    %cst = arith.constant dense<0.000000e+00> : vector<128x512xf32>
    %3 = tpu.matmul %1, %2, %cst {dimension_numbers = #tpu.dot_dimension_numbers<[1], [0], [0], [1], [0, 0, 1, 1], [], []>} : vector<128x64xf32>, vector<64x512xf32>, vector<128x512xf32> -> vector<128x512xf32>
    %c0_4 = arith.constant 0 : index
    %c0_5 = arith.constant 0 : index
    %4 = vector.load %arg4[%c0_4, %c0_5] : memref<1x512xf32, #tpu.memory_space<vmem>>, vector<1x512xf32>
    %5 = vector.broadcast %4 : vector<1x512xf32> to vector<128x512xf32>
    %6 = arith.addf %3, %5 : vector<128x512xf32>
    %7 = vector.shape_cast %6 : vector<128x512xf32> to vector<16x8x512xf32>
    %c0_6 = arith.constant 0 : index
    %c0_7 = arith.constant 0 : index
    %c0_8 = arith.constant 0 : index
    %8 = vector.load %arg6[%c0_6, %c0_7, %c0_8] : memref<16x8x512xf32, #tpu.memory_space<vmem>>, vector<16x8x512xf32>
    tpu.vector_store %arg6[%c0_6, %c0_7, %c0_8], %7 {strides = array<i32>} : memref<16x8x512xf32, #tpu.memory_space<vmem>>, vector<16x8x512xf32>,
    %cst_9 = arith.constant 0.000000e+00 : f32
    %9 = vector.broadcast %cst_9 : f32 to vector<8x128xf32>
    %c0_10 = arith.constant 0 : index
    %c0_11 = arith.constant 0 : index
    %10 = vector.load %arg7[%c0_10, %c0_11] : memref<8x128xf32, #tpu.memory_space<vmem>>, vector<8x128xf32>
    tpu.vector_store %arg7[%c0_10, %c0_11], %9 {strides = array<i32>} : memref<8x128xf32, #tpu.memory_space<vmem>>, vector<8x128xf32>,
    %cst_12 = arith.constant 0.000000e+00 : f32
    %11 = vector.broadcast %cst_12 : f32 to vector<8x128xf32>
    %c0_13 = arith.constant 0 : index
    %c0_14 = arith.constant 0 : index
    %12 = vector.load %arg8[%c0_13, %c0_14] : memref<8x128xf32, #tpu.memory_space<vmem>>, vector<8x128xf32>
    tpu.vector_store %arg8[%c0_13, %c0_14], %11 {strides = array<i32>} : memref<8x128xf32, #tpu.memory_space<vmem>>, vector<8x128xf32>,
    %c0_i32 = arith.constant 0 : i32
    %c16_i32 = arith.constant 16 : i32
    %13 = arith.addi %c0_i32, %c16_i32 : i32
    %c1_i32 = arith.constant 1 : i32
    scf.for %arg9 = %c0_i32 to %13 step %c1_i32  : i32 {
      %14 = arith.index_cast %arg9 : i32 to index
      %c0_16 = arith.constant 0 : index
      %c0_17 = arith.constant 0 : index
      %15 = vector.load %arg6[%14, %c0_16, %c0_17] : memref<16x8x512xf32, #tpu.memory_space<vmem>>, vector<1x8x512xf32>
      %16 = vector.shape_cast %15 : vector<1x8x512xf32> to vector<8x512xf32>
      %c0_18 = arith.constant 0 : index
      %c0_19 = arith.constant 0 : index
      %17 = vector.load %arg7[%c0_18, %c0_19] : memref<8x128xf32, #tpu.memory_space<vmem>>, vector<8x128xf32>
      %c0_20 = arith.constant 0 : index
      %c0_21 = arith.constant 0 : index
      %18 = vector.load %arg3[%c0_20, %c0_21] : memref<128x512xf32, #tpu.memory_space<vmem>>, vector<128x512xf32>
      %cst_22 = arith.constant dense<0.000000e+00> : vector<8x512xf32>
      %19 = tpu.matmul %17, %18, %cst_22 {dimension_numbers = #tpu.dot_dimension_numbers<[1], [0], [0], [1], [0, 0, 1, 1], [], []>} : vector<8x128xf32>, vector<128x512xf32>, vector<8x512xf32> -> vector<8x512xf32>
      %20 = arith.addf %16, %19 : vector<8x512xf32>
      %21 = vector.extract_strided_slice %20 {offsets = [0, 0], sizes = [8, 128], strides = [1, 1]} : vector<8x512xf32> to vector<8x128xf32>
      %cst_23 = arith.constant 0.000000e+00 : f32
      %22 = vector.broadcast %cst_23 : f32 to vector<8x128xf32>
      %23 = arith.subf %22, %21 : vector<8x128xf32>
      %24 = math.exp %23 : vector<8x128xf32>
      %cst_24 = arith.constant 1.000000e+00 : f32
      %25 = vector.broadcast %cst_24 : f32 to vector<8x128xf32>
      %26 = arith.addf %25, %24 : vector<8x128xf32>
      %cst_25 = arith.constant 1.000000e+00 : f32
      %27 = vector.broadcast %cst_25 : f32 to vector<8x128xf32>
      %28 = arith.divf %27, %26 : vector<8x128xf32>
      %29 = vector.extract_strided_slice %20 {offsets = [0, 128], sizes = [8, 128], strides = [1, 1]} : vector<8x512xf32> to vector<8x128xf32>
      %cst_26 = arith.constant 0.000000e+00 : f32
      %30 = vector.broadcast %cst_26 : f32 to vector<8x128xf32>
      %31 = arith.subf %30, %29 : vector<8x128xf32>
      %32 = math.exp %31 : vector<8x128xf32>
      %cst_27 = arith.constant 1.000000e+00 : f32
      %33 = vector.broadcast %cst_27 : f32 to vector<8x128xf32>
      %34 = arith.addf %33, %32 : vector<8x128xf32>
      %cst_28 = arith.constant 1.000000e+00 : f32
      %35 = vector.broadcast %cst_28 : f32 to vector<8x128xf32>
      %36 = arith.divf %35, %34 : vector<8x128xf32>
      %37 = vector.extract_strided_slice %20 {offsets = [0, 256], sizes = [8, 128], strides = [1, 1]} : vector<8x512xf32> to vector<8x128xf32>
      %38 = math.tanh %37 : vector<8x128xf32>
      %39 = vector.extract_strided_slice %20 {offsets = [0, 384], sizes = [8, 128], strides = [1, 1]} : vector<8x512xf32> to vector<8x128xf32>
      %cst_29 = arith.constant 0.000000e+00 : f32
      %40 = vector.broadcast %cst_29 : f32 to vector<8x128xf32>
      %41 = arith.subf %40, %39 : vector<8x128xf32>
      %42 = math.exp %41 : vector<8x128xf32>
      %cst_30 = arith.constant 1.000000e+00 : f32
      %43 = vector.broadcast %cst_30 : f32 to vector<8x128xf32>
      %44 = arith.addf %43, %42 : vector<8x128xf32>
      %cst_31 = arith.constant 1.000000e+00 : f32
      %45 = vector.broadcast %cst_31 : f32 to vector<8x128xf32>
      %46 = arith.divf %45, %44 : vector<8x128xf32>
      %c0_32 = arith.constant 0 : index
      %c0_33 = arith.constant 0 : index
      %47 = vector.load %arg8[%c0_32, %c0_33] : memref<8x128xf32, #tpu.memory_space<vmem>>, vector<8x128xf32>
      %48 = arith.mulf %36, %47 : vector<8x128xf32>
      %49 = arith.mulf %28, %38 : vector<8x128xf32>
      %50 = arith.addf %48, %49 : vector<8x128xf32>
      %51 = math.tanh %50 : vector<8x128xf32>
      %52 = arith.mulf %46, %51 : vector<8x128xf32>
      %c0_34 = arith.constant 0 : index
      %c0_35 = arith.constant 0 : index
      %53 = vector.load %arg8[%c0_34, %c0_35] : memref<8x128xf32, #tpu.memory_space<vmem>>, vector<8x128xf32>
      tpu.vector_store %arg8[%c0_34, %c0_35], %50 {strides = array<i32>} : memref<8x128xf32, #tpu.memory_space<vmem>>, vector<8x128xf32>,
      %c0_36 = arith.constant 0 : index
      %c0_37 = arith.constant 0 : index
      %54 = vector.load %arg7[%c0_36, %c0_37] : memref<8x128xf32, #tpu.memory_space<vmem>>, vector<8x128xf32>
      tpu.vector_store %arg7[%c0_36, %c0_37], %52 {strides = array<i32>} : memref<8x128xf32, #tpu.memory_space<vmem>>, vector<8x128xf32>,
      %55 = arith.index_cast %arg9 : i32 to index
      %c0_38 = arith.constant 0 : index
      %c0_39 = arith.constant 0 : index
      %56 = vector.load %arg5[%55, %c0_38, %c0_39] : memref<16x8x128xf32, #tpu.memory_space<vmem>>, vector<1x8x128xf32>
      %57 = vector.shape_cast %56 : vector<1x8x128xf32> to vector<8x128xf32>
      %58 = vector.shape_cast %52 : vector<8x128xf32> to vector<1x8x128xf32>
      tpu.vector_store %arg5[%55, %c0_38, %c0_39], %58 {strides = array<i32>} : memref<16x8x128xf32, #tpu.memory_space<vmem>>, vector<1x8x128xf32>,
    }
    %c16_i32_15 = arith.constant 16 : i32
    return
  }
  func.func @transform_0(%arg0: i32) -> (i32, i32, i32) {
    %c0_i32 = arith.constant 0 : i32
    %c0_i32_0 = arith.constant 0 : i32
    %c0_i32_1 = arith.constant 0 : i32
    return %c0_i32, %arg0, %c0_i32_0 : i32, i32, i32
  }
  func.func @transform_1(%arg0: i32) -> (i32, i32) {
    %c0_i32 = arith.constant 0 : i32
    %c0_i32_0 = arith.constant 0 : i32
    %c0_i32_1 = arith.constant 0 : i32
    return %c0_i32, %c0_i32_0 : i32, i32
  }
  func.func @transform_2(%arg0: i32) -> (i32, i32) {
    %c0_i32 = arith.constant 0 : i32
    %c0_i32_0 = arith.constant 0 : i32
    %c0_i32_1 = arith.constant 0 : i32
    return %c0_i32, %c0_i32_0 : i32, i32
  }
  func.func @transform_3(%arg0: i32) -> (i32, i32) {
    %c0_i32 = arith.constant 0 : i32
    %c0_i32_0 = arith.constant 0 : i32
    %c0_i32_1 = arith.constant 0 : i32
    return %c0_i32, %c0_i32_0 : i32, i32
  }
  func.func @transform_4(%arg0: i32) -> (i32, i32, i32) {
    %c0_i32 = arith.constant 0 : i32
    %c0_i32_0 = arith.constant 0 : i32
    %c0_i32_1 = arith.constant 0 : i32
    return %c0_i32, %arg0, %c0_i32_0 : i32, i32, i32
  }
}

</mosaic_0001>

<bundles_post_ra>
// kernel: tpu_custom_call.1
= control target key start
LH: loop header
LB: loop body
LE: loop exit
PB: predicated region body
PF: predicated region fallthrough
CT: control target
= control target key end

     0   :  { %9 = vsyncpa [#allocation6], 0  ;;  %s1361_s0 = inlined_call_operand.hbm [shape: f32[16,8,64], index: 0, kind: input, shape index: {}]   ;;  %s1362_s1 = inlined_call_operand.hbm [shape: f32[64,512], index: 1, kind: input, shape index: {}]   ;;  %s1363_s2 = inlined_call_operand.hbm [shape: f32[128,512], index: 2, kind: input, shape index: {}]   ;;  %s1364_s3 = inlined_call_operand.vmem [shape: f32[1,512], index: 3, kind: input, shape index: {}]   ;;  %s1365_s4 = inlined_call_operand.hbm [shape: f32[16,8,128], index: 4, kind: output, shape index: {}]  }
   0x1   :  { %10 = vsyncpa [#allocation9], 0 }
   0x2   :  { %11 = vsyncpa [#allocation7], 0  ;;  %s1115_s15 = smov [#allocation8]   ;;  %s1013_s19 = scalar_lea.hbm %s1362_s1, 4096 }
   0x3   :  { %s29_s16 = sshll.u32 %s1115_s15, 4  ;;  %p1014_p0 = scmp.ne.s32.totalorder %s1362_s1, %s1013_s19  ;;  %s30_s16 = int_to_ptr.vmem [resolvable:$true] %s29_s16 }
   0x4   :  { %p1017_p1 = scmp.lt.u32.totalorder %s1013_s19, %s1362_s1 }
   0x6   :  { %p1019_p2 = pnand %p1017_p1, %p1014_p0 }
   0x8   :  { %1022 = shalt.err (!%p1019_p2)
}
   0x9   :  { %s1023_s24 = scalar_lea.vmem %s30_s16, 4096  ;;  %p1028_p4 = scmp.lt.s32.totalorder %s30_s16, %s30_s16 }
   0xa   :  { %p1024_p3 = scmp.ne.s32.totalorder %s30_s16, %s1023_s24  ;;  %p1029_p5 = scmp.lt.s32.totalorder %s1023_s24, %s1023_s24 }
   0xc   :  { %p1030_p6 = por %p1029_p5, %p1028_p4 }
   0xe   :  { %p1031_p7 = pnand %p1030_p6, %p1024_p3 }
  0x10   :  { %1034 = shalt.err (!%p1031_p7)
}
  0x11   :  { %s1116_s25 = smov 512   ;;  %s1117_s26 = smov 32  }
  0x12   :  { %35 = dma.hbm_to_vmem [thread:$0]  %s1362_s1, 4096, %s30_s16, [#allocation9], %s1116_s25, %s1116_s25, %s1117_s26  }
  0x13   :  { %s1118_s29 = smov [#allocation5]   ;;  %s1035_s7 = scalar_lea.hbm %s1361_s0, 2048 }
  0x14   :  { %s17_s30 = sshll.u32 %s1118_s29, 4  ;;  %p1036_p8 = scmp.ne.s32.totalorder %s1361_s0, %s1035_s7  ;;  %s18_s30 = int_to_ptr.vmem [resolvable:$true] %s17_s30 }
  0x15   :  { %p1039_p9 = scmp.lt.u32.totalorder %s1035_s7, %s1361_s0 }
  0x17   :  { %p1041_p10 = pnand %p1039_p9, %p1036_p8 }
  0x19   :  { %1044 = shalt.err (!%p1041_p10)
}
  0x1a   :  { %s1045_s12 = scalar_lea.vmem %s18_s30, 2048  ;;  %p1050_p12 = scmp.lt.s32.totalorder %s18_s30, %s18_s30 }
  0x1b   :  { %p1046_p11 = scmp.ne.s32.totalorder %s18_s30, %s1045_s12  ;;  %p1051_p13 = scmp.lt.s32.totalorder %s1045_s12, %s1045_s12 }
  0x1d   :  { %p1052_p0 = por %p1051_p13, %p1050_p12 }
  0x1f   :  { %p1053_p1 = pnand %p1052_p0, %p1046_p11 }
  0x21   :  { %1056 = shalt.err (!%p1053_p1)
}
  0x22   :  { %s1119_s1 = smov 128   ;;  %s1120_s13 = smov 8  }
  0x23   :  { %23 = dma.hbm_to_vmem [thread:$0]  %s1361_s0, 2048, %s18_s30, [#allocation6], %s1119_s1, %s1119_s1, %s1120_s13  }
  0x24   :  { %s1121_s16 = smov [#allocation10]   ;;  %s1057_s20 = scalar_lea.hbm %s1363_s2, 8192 }
  0x25   :  { %s41_s17 = sshll.u32 %s1121_s16, 4  ;;  %p1058_p2 = scmp.ne.s32.totalorder %s1363_s2, %s1057_s20  ;;  %s42_s17 = int_to_ptr.vmem [resolvable:$true] %s41_s17 }
  0x26   :  { %p1061_p3 = scmp.lt.u32.totalorder %s1057_s20, %s1363_s2 }
  0x28   :  { %p1063_p4 = pnand %p1061_p3, %p1058_p2 }
  0x2a   :  { %1066 = shalt.err (!%p1063_p4)
}
  0x2b   :  { %s1067_s27 = scalar_lea.vmem %s42_s17, 8192  ;;  %p1072_p6 = scmp.lt.s32.totalorder %s42_s17, %s42_s17 }
  0x2c   :  { %p1068_p5 = scmp.ne.s32.totalorder %s42_s17, %s1067_s27  ;;  %p1073_p7 = scmp.lt.s32.totalorder %s1067_s27, %s1067_s27 }
  0x2e   :  { %p1074_p8 = por %p1073_p7, %p1072_p6 }
  0x30   :  { %p1075_p9 = pnand %p1074_p8, %p1068_p5 }
  0x32   :  { %1078 = shalt.err (!%p1075_p9)
}
  0x33   :  { %47 = dma.hbm_to_vmem [thread:$0]  %s1363_s2, 8192, %s42_s17, [#allocation9], %s1116_s25, %s1116_s25, %s1117_s26  }
  0x34   :  { %1105 = dma.done.wait [#allocation6], 2048  }
  0x35   :  { %1106 = vsyncadd [#allocation6], 4294965248 }
  0x36   :  { %1107 = dma.done.wait [#allocation9], 12288  }
  0x37   :  { %1108 = vsyncadd [#allocation9], 4294955008  ;;  %v1122_v0 = vmov 0.0   ;;  %v76_v1 = vld [vmem:[#allocation8 + $0x8] sm:$0xff]  ;;  %v78_v3 = vld [vmem:[#allocation8 + $0x18] sm:$0xff]  ;;  %vm129_vm0 = vcmask 523264  }
  0x38   :  { %564 = vst [vmem:[#allocation3] sm:$0xff] %v1122_v0  ;;  %565 = vst [vmem:[#allocation4] sm:$0xff] %v1122_v0  ;;  %242 = vmatprep.mubr.f32.mxu0 %v1122_v0  ;;  %403 = vmatprep.mubr.f32.mxu1 %v1122_v0  ;;  %v80_v2 = vld [vmem:[#allocation8 + $0x28] sm:$0xff]  ;;  %v82_v5 = vld [vmem:[#allocation8 + $0x38] sm:$0xff] }
  0x39   :  { %v883_v4 = vpack.c.bf16 %v80_v2, %v76_v1  ;;  %v75_v6 = vld [vmem:[#allocation8] sm:$0xff]  ;;  %v899_v8 = vpack.c.bf16 %v82_v5, %v78_v3  ;;  %v77_v10 = vld [vmem:[#allocation8 + $0x10] sm:$0xff]  ;;  %v84_v12 = vld [vmem:[#allocation8 + $0x48] sm:$0xff]  ;;  %v109_v2 = vlaneseq }
  0x3a   :  { %v79_v7 = vld [vmem:[#allocation8 + $0x20] sm:$0xff]  ;;  %v81_v11 = vld [vmem:[#allocation8 + $0x30] sm:$0xff]  ;;  %v88_v14 = vld [vmem:[#allocation8 + $0x68] sm:$0xff] }
  0x3b   :  { %v885_v9 = vpack.c.bf16 %v79_v7, %v75_v6  ;;  %884 = vmatprep.subr.bf16.mxu0 %v883_v4  ;;  %v901_v13 = vpack.c.bf16 %v81_v11, %v77_v10  ;;  %v86_v15 = vld [vmem:[#allocation8 + $0x58] sm:$0xff]  ;;  %900 = vmatprep.subr.bf16.mxu1 %v899_v8  ;;  %v887_v17 = vpack.c.bf16 %v88_v14, %v84_v12  ;;  %v83_v19 = vld [vmem:[#allocation8 + $0x40] sm:$0xff]  ;;  %v85_v21 = vld [vmem:[#allocation8 + $0x50] sm:$0xff]  ;;  %v110_v3 = vshrl.u32 %v109_v2, 7 }
  0x3c   :  { %v90_v16 = vld [vmem:[#allocation8 + $0x78] sm:$0xff]  ;;  %v87_v20 = vld [vmem:[#allocation8 + $0x60] sm:$0xff]  ;;  %v89_v23 = vld [vmem:[#allocation8 + $0x70] sm:$0xff] }
  0x3d   :  { %886 = vmatpush1.bf16.msra.mxu0 %v885_v9  ;;  %v903_v18 = vpack.c.bf16 %v90_v16, %v86_v15  ;;  %902 = vmatpush1.bf16.msra.mxu1 %v901_v13  ;;  %v889_v22 = vpack.c.bf16 %v87_v20, %v83_v19  ;;  %v92_v24 = vld [vmem:[#allocation8 + $0x88] sm:$0xff]  ;;  %v905_v26 = vpack.c.bf16 %v89_v23, %v85_v21  ;;  %v94_v28 = vld [vmem:[#allocation8 + $0x98] sm:$0xff]  ;;  %v91_v30 = vld [vmem:[#allocation8 + $0x80] sm:$0xff]  ;;  %v111_v4 = vsub.s32 0, %v110_v3 }
  0x3e   :  { %v96_v25 = vld [vmem:[#allocation8 + $0xa8] sm:$0xff]  ;;  %888 = vmatprep.subr.bf16.mxu0 %v887_v17  ;;  %v98_v29 = vld [vmem:[#allocation8 + $0xb8] sm:$0xff]  ;;  %v95_v32 = vld [vmem:[#allocation8 + $0xa0] sm:$0xff]  ;;  %v119_v6 = vsub.s32 2, %v110_v3  ;;  %v115_v7 = vsub.s32 1, %v110_v3  ;;  %v123_v8 = vsub.s32 3, %v110_v3 }
  0x3f   :  { %904 = vmatprep.subr.bf16.mxu1 %v903_v18  ;;  %v891_v27 = vpack.c.bf16 %v96_v25, %v92_v24  ;;  %v907_v31 = vpack.c.bf16 %v98_v29, %v94_v28  ;;  %v93_v33 = vld [vmem:[#allocation8 + $0x90] sm:$0xff]  ;;  %v893_v35 = vpack.c.bf16 %v95_v32, %v91_v30  ;;  %v100_v36 = vld [vmem:[#allocation8 + $0xc8] sm:$0xff]  ;;  %v102_v38 = vld [vmem:[#allocation8 + $0xd8] sm:$0xff] }
  0x40   :  { %v97_v34 = vld [vmem:[#allocation8 + $0xb0] sm:$0xff]  ;;  %v104_v37 = vld [vmem:[#allocation8 + $0xe8] sm:$0xff]  ;;  %v106_v41 = vld [vmem:[#allocation8 + $0xf8] sm:$0xff] }
  0x41   :  { %890 = vmatpush1.bf16.msra.mxu0 %v889_v22  ;;  %906 = vmatpush1.bf16.msra.mxu1 %v905_v26  ;;  %v909_v39 = vpack.c.bf16 %v97_v34, %v93_v33  ;;  %v895_v40 = vpack.c.bf16 %v104_v37, %v100_v36  ;;  %v99_v42 = vld [vmem:[#allocation8 + $0xc0] sm:$0xff]  ;;  %v911_v44 = vpack.c.bf16 %v106_v41, %v102_v38  ;;  %v101_v45 = vld [vmem:[#allocation8 + $0xd0] sm:$0xff]  ;;  %v60_v50 = vld [vmem:[#allocation5 + $0x8] sm:$0xff] }
  0x42   :  { %892 = vmatprep.subr.bf16.mxu0 %v891_v27  ;;  %v103_v43 = vld [vmem:[#allocation8 + $0xe0] sm:$0xff]  ;;  %908 = vmatprep.subr.bf16.mxu1 %v907_v31  ;;  %v105_v46 = vld [vmem:[#allocation8 + $0xf0] sm:$0xff]  ;;  %v62_v52 = vld [vmem:[#allocation5 + $0x18] sm:$0xff] }
  0x43   :  { %v897_v47 = vpack.c.bf16 %v103_v43, %v99_v42  ;;  %v913_v48 = vpack.c.bf16 %v105_v46, %v101_v45  ;;  %v59_v49 = vld [vmem:[#allocation5] sm:$0xff]  ;;  %v61_v51 = vld [vmem:[#allocation5 + $0x10] sm:$0xff]  ;;  %v64_v54 = vld [vmem:[#allocation5 + $0x28] sm:$0xff] }
  0x44   :  { %v63_v53 = vld [vmem:[#allocation5 + $0x20] sm:$0xff]  ;;  %v65_v55 = vld [vmem:[#allocation5 + $0x30] sm:$0xff]  ;;  %v66_v56 = vld [vmem:[#allocation5 + $0x38] sm:$0xff] }
  0x45   :  { %894 = vmatpush1.bf16.msra.mxu0 %v893_v35  ;;  %910 = vmatpush1.bf16.msra.mxu1 %v909_v39  ;;  %v67_v57 = vld [vmem:[#allocation5 + $0x40] sm:$0xff]  ;;  %v68_v58 = vld [vmem:[#allocation5 + $0x48] sm:$0xff]  ;;  %v69_v59 = vld [vmem:[#allocation5 + $0x50] sm:$0xff] }
  0x46   :  { %896 = vmatprep.subr.bf16.mxu0 %v895_v40  ;;  %912 = vmatprep.subr.bf16.mxu1 %v911_v44  ;;  %v70_v60 = vld [vmem:[#allocation5 + $0x58] sm:$0xff]  ;;  %v71_v61 = vld [vmem:[#allocation5 + $0x60] sm:$0xff]  ;;  %v72_v62 = vld [vmem:[#allocation5 + $0x68] sm:$0xff] }
  0x47   :  { %v73_v63 = vld [vmem:[#allocation5 + $0x70] sm:$0xff]  ;;  %v74_v1 = vld [vmem:[#allocation5 + $0x78] sm:$0xff] }
  0x48   :  { %v107_v5 = vld [vmem:[%s1364_s3] sm:$0xf]  ;;  %s1336_s3 = smov 0  }
  0x49   :  { %898 = vmatpush1.bf16.msra.mxu0 %v897_v47  ;;  %914 = vmatpush1.bf16.msra.mxu1 %v913_v48  ;;  %v1264_v9 = vrot.slane %v107_v5, %v111_v4  ;;  %v1266_v10 = vrot.slane %v107_v5, %v119_v6  ;;  %v1268_v11 = vrot.slane %v107_v5, %v115_v7 }
  0x4c   :  { %847 = vmatmul.mubr.msk.f32.vlgmr.msra.gmra.mrb[0].mxu0 %vm129_vm0, %v59_v49  ;;  %863 = vmatmul.mubr.msk.f32.vlgmr.msra.gmra.mrb[0].mxu1 %vm129_vm0, %v59_v49 }
  0x4d   :  { %248 = vmatprep.mubr.f32.mxu0 %v1122_v0  ;;  %409 = vmatprep.mubr.f32.mxu1 %v1122_v0 }
  0x50   :  { %848 = vmatmul.mubr.msk.f32.gmra.mrb[2].mxu0 %vm129_vm0, %v60_v50  ;;  %864 = vmatmul.mubr.msk.f32.gmra.mrb[2].mxu1 %vm129_vm0, %v60_v50 }
  0x51   :  { %254 = vmatprep.mubr.f32.mxu0 %v1122_v0  ;;  %415 = vmatprep.mubr.f32.mxu1 %v1122_v0 }
  0x54   :  { %849 = vmatmul.mubr.msk.f32.gmra.mrb[4].mxu0 %vm129_vm0, %v61_v51  ;;  %865 = vmatmul.mubr.msk.f32.gmra.mrb[4].mxu1 %vm129_vm0, %v61_v51 }
  0x55   :  { %260 = vmatprep.mubr.f32.mxu0 %v1122_v0  ;;  %421 = vmatprep.mubr.f32.mxu1 %v1122_v0 }
  0x58   :  { %850 = vmatmul.mubr.msk.f32.gmra.mrb[6].mxu0 %vm129_vm0, %v62_v52  ;;  %866 = vmatmul.mubr.msk.f32.gmra.mrb[6].mxu1 %vm129_vm0, %v62_v52 }
  0x59   :  { %266 = vmatprep.mubr.f32.mxu0 %v1122_v0  ;;  %427 = vmatprep.mubr.f32.mxu1 %v1122_v0 }
  0x5c   :  { %851 = vmatmul.mubr.msk.f32.gmra.mrb[8].mxu0 %vm129_vm0, %v63_v53  ;;  %867 = vmatmul.mubr.msk.f32.gmra.mrb[8].mxu1 %vm129_vm0, %v63_v53 }
  0x5d   :  { %272 = vmatprep.mubr.f32.mxu0 %v1122_v0  ;;  %433 = vmatprep.mubr.f32.mxu1 %v1122_v0 }
  0x60   :  { %852 = vmatmul.mubr.msk.f32.gmra.mrb[10].mxu0 %vm129_vm0, %v64_v54  ;;  %868 = vmatmul.mubr.msk.f32.gmra.mrb[10].mxu1 %vm129_vm0, %v64_v54 }
  0x61   :  { %278 = vmatprep.mubr.f32.mxu0 %v1122_v0  ;;  %439 = vmatprep.mubr.f32.mxu1 %v1122_v0 }
  0x64   :  { %853 = vmatmul.mubr.msk.f32.gmra.mrb[12].mxu0 %vm129_vm0, %v65_v55  ;;  %869 = vmatmul.mubr.msk.f32.gmra.mrb[12].mxu1 %vm129_vm0, %v65_v55 }
  0x65   :  { %284 = vmatprep.mubr.f32.mxu0 %v1122_v0  ;;  %445 = vmatprep.mubr.f32.mxu1 %v1122_v0 }
  0x68   :  { %854 = vmatmul.mubr.msk.f32.gmra.mrb[14].mxu0 %vm129_vm0, %v66_v56  ;;  %870 = vmatmul.mubr.msk.f32.gmra.mrb[14].mxu1 %vm129_vm0, %v66_v56 }
  0x69   :  { %290 = vmatprep.mubr.f32.mxu0 %v1122_v0  ;;  %451 = vmatprep.mubr.f32.mxu1 %v1122_v0 }
  0x6c   :  { %855 = vmatmul.mubr.msk.f32.gmra.mrb[16].mxu0 %vm129_vm0, %v67_v57  ;;  %871 = vmatmul.mubr.msk.f32.gmra.mrb[16].mxu1 %vm129_vm0, %v67_v57 }
  0x6d   :  { %296 = vmatprep.mubr.f32.mxu0 %v1122_v0  ;;  %457 = vmatprep.mubr.f32.mxu1 %v1122_v0 }
  0x70   :  { %856 = vmatmul.mubr.msk.f32.gmra.mrb[18].mxu0 %vm129_vm0, %v68_v58  ;;  %872 = vmatmul.mubr.msk.f32.gmra.mrb[18].mxu1 %vm129_vm0, %v68_v58 }
  0x71   :  { %302 = vmatprep.mubr.f32.mxu0 %v1122_v0  ;;  %463 = vmatprep.mubr.f32.mxu1 %v1122_v0 }
  0x74   :  { %857 = vmatmul.mubr.msk.f32.gmra.mrb[20].mxu0 %vm129_vm0, %v69_v59  ;;  %873 = vmatmul.mubr.msk.f32.gmra.mrb[20].mxu1 %vm129_vm0, %v69_v59 }
  0x75   :  { %308 = vmatprep.mubr.f32.mxu0 %v1122_v0  ;;  %469 = vmatprep.mubr.f32.mxu1 %v1122_v0 }
  0x78   :  { %858 = vmatmul.mubr.msk.f32.gmra.mrb[22].mxu0 %vm129_vm0, %v70_v60  ;;  %874 = vmatmul.mubr.msk.f32.gmra.mrb[22].mxu1 %vm129_vm0, %v70_v60 }
  0x79   :  { %314 = vmatprep.mubr.f32.mxu0 %v1122_v0  ;;  %475 = vmatprep.mubr.f32.mxu1 %v1122_v0 }
  0x7c   :  { %859 = vmatmul.mubr.msk.f32.gmra.mrb[24].mxu0 %vm129_vm0, %v71_v61  ;;  %875 = vmatmul.mubr.msk.f32.gmra.mrb[24].mxu1 %vm129_vm0, %v71_v61 }
  0x7d   :  { %320 = vmatprep.mubr.f32.mxu0 %v1122_v0  ;;  %481 = vmatprep.mubr.f32.mxu1 %v1122_v0 }
  0x80   :  { %860 = vmatmul.mubr.msk.f32.gmra.mrb[26].mxu0 %vm129_vm0, %v72_v62  ;;  %876 = vmatmul.mubr.msk.f32.gmra.mrb[26].mxu1 %vm129_vm0, %v72_v62 }
  0x81   :  { %326 = vmatprep.mubr.f32.mxu0 %v1122_v0  ;;  %487 = vmatprep.mubr.f32.mxu1 %v1122_v0 }
  0x84   :  { %861 = vmatmul.mubr.msk.f32.gmra.mrb[28].mxu0 %vm129_vm0, %v73_v63  ;;  %877 = vmatmul.mubr.msk.f32.gmra.mrb[28].mxu1 %vm129_vm0, %v73_v63 }
  0x85   :  { %332 = vmatprep.mubr.f32.mxu0 %v1122_v0  ;;  %493 = vmatprep.mubr.f32.mxu1 %v1122_v0  ;;  %v1270_v0 = vrot.slane %v107_v5, %v123_v8 }
  0x88   :  { %862 = vmatmul.mubr.msk.f32.gmra.mrb[30].mxu0 %vm129_vm0, %v74_v1  ;;  %878 = vmatmul.mubr.msk.f32.gmra.mrb[30].mxu1 %vm129_vm0, %v74_v1 }
 0x11f   :  { %v244_v12 = vpop.f32.mrb[0].mxu0  ;;  %v405_v14 = vpop.f32.mrb[0].mxu1 }
 0x120   :  { %v245_v13 = vadd.f32 %v244_v12, %v1264_v9  ;;  %v246_v15 = vpop.f32.mrb[1].mxu0  ;;  %v406_v16 = vadd.f32 %v405_v14, %v1266_v10  ;;  %v407_v18 = vpop.f32.mrb[1].mxu1 }
 0x121   :  { %v247_v17 = vadd.f32 %v246_v15, %v1268_v11  ;;  %v408_v19 = vadd.f32 %v407_v18, %v1270_v0 }
 0x122   :  { %500 = vst [vmem:[#allocation2] sm:$0xff] %v245_v13  ;;  %502 = vst [vmem:[#allocation2 + $0x10] sm:$0xff] %v406_v16 }
 0x123   :  { %501 = vst [vmem:[#allocation2 + $0x8] sm:$0xff] %v247_v17  ;;  %v250_v20 = vpop.f32.mrb[2].mxu0  ;;  %503 = vst [vmem:[#allocation2 + $0x18] sm:$0xff] %v408_v19  ;;  %v411_v22 = vpop.f32.mrb[2].mxu1 }
 0x124   :  { %v251_v21 = vadd.f32 %v250_v20, %v1264_v9  ;;  %v252_v23 = vpop.f32.mrb[3].mxu0  ;;  %v412_v24 = vadd.f32 %v411_v22, %v1266_v10  ;;  %v413_v26 = vpop.f32.mrb[3].mxu1 }
 0x125   :  { %v253_v25 = vadd.f32 %v252_v23, %v1268_v11  ;;  %v414_v27 = vadd.f32 %v413_v26, %v1270_v0 }
 0x126   :  { %504 = vst [vmem:[#allocation2 + $0x20] sm:$0xff] %v251_v21  ;;  %506 = vst [vmem:[#allocation2 + $0x30] sm:$0xff] %v412_v24 }
 0x127   :  { %505 = vst [vmem:[#allocation2 + $0x28] sm:$0xff] %v253_v25  ;;  %v256_v28 = vpop.f32.mrb[4].mxu0  ;;  %507 = vst [vmem:[#allocation2 + $0x38] sm:$0xff] %v414_v27  ;;  %v417_v30 = vpop.f32.mrb[4].mxu1 }
 0x128   :  { %v257_v29 = vadd.f32 %v256_v28, %v1264_v9  ;;  %v258_v31 = vpop.f32.mrb[5].mxu0  ;;  %v418_v32 = vadd.f32 %v417_v30, %v1266_v10  ;;  %v419_v34 = vpop.f32.mrb[5].mxu1 }
 0x129   :  { %v259_v33 = vadd.f32 %v258_v31, %v1268_v11  ;;  %v420_v35 = vadd.f32 %v419_v34, %v1270_v0 }
 0x12a   :  { %508 = vst [vmem:[#allocation2 + $0x40] sm:$0xff] %v257_v29  ;;  %510 = vst [vmem:[#allocation2 + $0x50] sm:$0xff] %v418_v32 }
 0x12b   :  { %509 = vst [vmem:[#allocation2 + $0x48] sm:$0xff] %v259_v33  ;;  %v262_v36 = vpop.f32.mrb[6].mxu0  ;;  %511 = vst [vmem:[#allocation2 + $0x58] sm:$0xff] %v420_v35  ;;  %v423_v38 = vpop.f32.mrb[6].mxu1 }
 0x12c   :  { %v263_v37 = vadd.f32 %v262_v36, %v1264_v9  ;;  %v264_v39 = vpop.f32.mrb[7].mxu0  ;;  %v424_v40 = vadd.f32 %v423_v38, %v1266_v10  ;;  %v425_v42 = vpop.f32.mrb[7].mxu1 }
 0x12d   :  { %v265_v41 = vadd.f32 %v264_v39, %v1268_v11  ;;  %v426_v43 = vadd.f32 %v425_v42, %v1270_v0 }
 0x12e   :  { %512 = vst [vmem:[#allocation2 + $0x60] sm:$0xff] %v263_v37  ;;  %514 = vst [vmem:[#allocation2 + $0x70] sm:$0xff] %v424_v40 }
 0x12f   :  { %513 = vst [vmem:[#allocation2 + $0x68] sm:$0xff] %v265_v41  ;;  %v268_v44 = vpop.f32.mrb[8].mxu0  ;;  %515 = vst [vmem:[#allocation2 + $0x78] sm:$0xff] %v426_v43  ;;  %v429_v46 = vpop.f32.mrb[8].mxu1 }
 0x130   :  { %v269_v45 = vadd.f32 %v268_v44, %v1264_v9  ;;  %v270_v47 = vpop.f32.mrb[9].mxu0  ;;  %v430_v48 = vadd.f32 %v429_v46, %v1266_v10  ;;  %v431_v50 = vpop.f32.mrb[9].mxu1 }
 0x131   :  { %v271_v49 = vadd.f32 %v270_v47, %v1268_v11  ;;  %v432_v51 = vadd.f32 %v431_v50, %v1270_v0 }
 0x132   :  { %516 = vst [vmem:[#allocation2 + $0x80] sm:$0xff] %v269_v45  ;;  %518 = vst [vmem:[#allocation2 + $0x90] sm:$0xff] %v430_v48 }
 0x133   :  { %517 = vst [vmem:[#allocation2 + $0x88] sm:$0xff] %v271_v49  ;;  %v274_v52 = vpop.f32.mrb[10].mxu0  ;;  %519 = vst [vmem:[#allocation2 + $0x98] sm:$0xff] %v432_v51  ;;  %v435_v54 = vpop.f32.mrb[10].mxu1 }
 0x134   :  { %v275_v53 = vadd.f32 %v274_v52, %v1264_v9  ;;  %v276_v55 = vpop.f32.mrb[11].mxu0  ;;  %v436_v56 = vadd.f32 %v435_v54, %v1266_v10  ;;  %v437_v58 = vpop.f32.mrb[11].mxu1 }
 0x135   :  { %v277_v57 = vadd.f32 %v276_v55, %v1268_v11  ;;  %v438_v59 = vadd.f32 %v437_v58, %v1270_v0 }
 0x136   :  { %520 = vst [vmem:[#allocation2 + $0xa0] sm:$0xff] %v275_v53  ;;  %522 = vst [vmem:[#allocation2 + $0xb0] sm:$0xff] %v436_v56 }
 0x137   :  { %521 = vst [vmem:[#allocation2 + $0xa8] sm:$0xff] %v277_v57  ;;  %v280_v60 = vpop.f32.mrb[12].mxu0  ;;  %523 = vst [vmem:[#allocation2 + $0xb8] sm:$0xff] %v438_v59  ;;  %v441_v62 = vpop.f32.mrb[12].mxu1 }
 0x138   :  { %v281_v61 = vadd.f32 %v280_v60, %v1264_v9  ;;  %v282_v63 = vpop.f32.mrb[13].mxu0  ;;  %v442_v1 = vadd.f32 %v441_v62, %v1266_v10  ;;  %v443_v3 = vpop.f32.mrb[13].mxu1 }
 0x139   :  { %v283_v2 = vadd.f32 %v282_v63, %v1268_v11  ;;  %v444_v4 = vadd.f32 %v443_v3, %v1270_v0 }
 0x13a   :  { %524 = vst [vmem:[#allocation2 + $0xc0] sm:$0xff] %v281_v61  ;;  %526 = vst [vmem:[#allocation2 + $0xd0] sm:$0xff] %v442_v1 }
 0x13b   :  { %525 = vst [vmem:[#allocation2 + $0xc8] sm:$0xff] %v283_v2  ;;  %v286_v5 = vpop.f32.mrb[14].mxu0  ;;  %527 = vst [vmem:[#allocation2 + $0xd8] sm:$0xff] %v444_v4  ;;  %v447_v7 = vpop.f32.mrb[14].mxu1 }
 0x13c   :  { %v287_v6 = vadd.f32 %v286_v5, %v1264_v9  ;;  %v288_v8 = vpop.f32.mrb[15].mxu0  ;;  %v448_v12 = vadd.f32 %v447_v7, %v1266_v10  ;;  %v449_v14 = vpop.f32.mrb[15].mxu1 }
 0x13d   :  { %v289_v13 = vadd.f32 %v288_v8, %v1268_v11  ;;  %v450_v15 = vadd.f32 %v449_v14, %v1270_v0 }
 0x13e   :  { %528 = vst [vmem:[#allocation2 + $0xe0] sm:$0xff] %v287_v6  ;;  %530 = vst [vmem:[#allocation2 + $0xf0] sm:$0xff] %v448_v12 }
 0x13f   :  { %529 = vst [vmem:[#allocation2 + $0xe8] sm:$0xff] %v289_v13  ;;  %v292_v16 = vpop.f32.mrb[16].mxu0  ;;  %531 = vst [vmem:[#allocation2 + $0xf8] sm:$0xff] %v450_v15  ;;  %v453_v18 = vpop.f32.mrb[16].mxu1 }
 0x140   :  { %v293_v17 = vadd.f32 %v292_v16, %v1264_v9  ;;  %v294_v19 = vpop.f32.mrb[17].mxu0  ;;  %v454_v20 = vadd.f32 %v453_v18, %v1266_v10  ;;  %v455_v22 = vpop.f32.mrb[17].mxu1 }
 0x141   :  { %v295_v21 = vadd.f32 %v294_v19, %v1268_v11  ;;  %v456_v23 = vadd.f32 %v455_v22, %v1270_v0 }
 0x142   :  { %532 = vst [vmem:[#allocation2 + $0x100] sm:$0xff] %v293_v17  ;;  %534 = vst [vmem:[#allocation2 + $0x110] sm:$0xff] %v454_v20 }
 0x143   :  { %533 = vst [vmem:[#allocation2 + $0x108] sm:$0xff] %v295_v21  ;;  %v298_v24 = vpop.f32.mrb[18].mxu0  ;;  %535 = vst [vmem:[#allocation2 + $0x118] sm:$0xff] %v456_v23  ;;  %v459_v26 = vpop.f32.mrb[18].mxu1 }
 0x144   :  { %v299_v25 = vadd.f32 %v298_v24, %v1264_v9  ;;  %v300_v27 = vpop.f32.mrb[19].mxu0  ;;  %v460_v28 = vadd.f32 %v459_v26, %v1266_v10  ;;  %v461_v30 = vpop.f32.mrb[19].mxu1 }
 0x145   :  { %v301_v29 = vadd.f32 %v300_v27, %v1268_v11  ;;  %v462_v31 = vadd.f32 %v461_v30, %v1270_v0 }
 0x146   :  { %536 = vst [vmem:[#allocation2 + $0x120] sm:$0xff] %v299_v25  ;;  %538 = vst [vmem:[#allocation2 + $0x130] sm:$0xff] %v460_v28 }
 0x147   :  { %537 = vst [vmem:[#allocation2 + $0x128] sm:$0xff] %v301_v29  ;;  %v304_v32 = vpop.f32.mrb[20].mxu0  ;;  %539 = vst [vmem:[#allocation2 + $0x138] sm:$0xff] %v462_v31  ;;  %v465_v34 = vpop.f32.mrb[20].mxu1 }
 0x148   :  { %v305_v33 = vadd.f32 %v304_v32, %v1264_v9  ;;  %v306_v35 = vpop.f32.mrb[21].mxu0  ;;  %v466_v36 = vadd.f32 %v465_v34, %v1266_v10  ;;  %v467_v38 = vpop.f32.mrb[21].mxu1 }
 0x149   :  { %v307_v37 = vadd.f32 %v306_v35, %v1268_v11  ;;  %v468_v39 = vadd.f32 %v467_v38, %v1270_v0 }
 0x14a   :  { %540 = vst [vmem:[#allocation2 + $0x140] sm:$0xff] %v305_v33  ;;  %542 = vst [vmem:[#allocation2 + $0x150] sm:$0xff] %v466_v36 }
 0x14b   :  { %541 = vst [vmem:[#allocation2 + $0x148] sm:$0xff] %v307_v37  ;;  %v310_v40 = vpop.f32.mrb[22].mxu0  ;;  %543 = vst [vmem:[#allocation2 + $0x158] sm:$0xff] %v468_v39  ;;  %v471_v42 = vpop.f32.mrb[22].mxu1 }
 0x14c   :  { %v311_v41 = vadd.f32 %v310_v40, %v1264_v9  ;;  %v312_v43 = vpop.f32.mrb[23].mxu0  ;;  %v472_v44 = vadd.f32 %v471_v42, %v1266_v10  ;;  %v473_v46 = vpop.f32.mrb[23].mxu1 }
 0x14d   :  { %v313_v45 = vadd.f32 %v312_v43, %v1268_v11  ;;  %v474_v47 = vadd.f32 %v473_v46, %v1270_v0 }
 0x14e   :  { %544 = vst [vmem:[#allocation2 + $0x160] sm:$0xff] %v311_v41  ;;  %546 = vst [vmem:[#allocation2 + $0x170] sm:$0xff] %v472_v44 }
 0x14f   :  { %545 = vst [vmem:[#allocation2 + $0x168] sm:$0xff] %v313_v45  ;;  %v316_v48 = vpop.f32.mrb[24].mxu0  ;;  %547 = vst [vmem:[#allocation2 + $0x178] sm:$0xff] %v474_v47  ;;  %v477_v50 = vpop.f32.mrb[24].mxu1 }
 0x150   :  { %v317_v49 = vadd.f32 %v316_v48, %v1264_v9  ;;  %v318_v51 = vpop.f32.mrb[25].mxu0  ;;  %v478_v52 = vadd.f32 %v477_v50, %v1266_v10  ;;  %v479_v54 = vpop.f32.mrb[25].mxu1 }
 0x151   :  { %v319_v53 = vadd.f32 %v318_v51, %v1268_v11  ;;  %v480_v55 = vadd.f32 %v479_v54, %v1270_v0 }
 0x152   :  { %548 = vst [vmem:[#allocation2 + $0x180] sm:$0xff] %v317_v49  ;;  %550 = vst [vmem:[#allocation2 + $0x190] sm:$0xff] %v478_v52 }
 0x153   :  { %549 = vst [vmem:[#allocation2 + $0x188] sm:$0xff] %v319_v53  ;;  %v322_v56 = vpop.f32.mrb[26].mxu0  ;;  %551 = vst [vmem:[#allocation2 + $0x198] sm:$0xff] %v480_v55  ;;  %v483_v58 = vpop.f32.mrb[26].mxu1 }
 0x154   :  { %v323_v57 = vadd.f32 %v322_v56, %v1264_v9  ;;  %v324_v59 = vpop.f32.mrb[27].mxu0  ;;  %v484_v60 = vadd.f32 %v483_v58, %v1266_v10  ;;  %v485_v62 = vpop.f32.mrb[27].mxu1 }
 0x155   :  { %v325_v61 = vadd.f32 %v324_v59, %v1268_v11  ;;  %v486_v63 = vadd.f32 %v485_v62, %v1270_v0 }
 0x156   :  { %552 = vst [vmem:[#allocation2 + $0x1a0] sm:$0xff] %v323_v57  ;;  %554 = vst [vmem:[#allocation2 + $0x1b0] sm:$0xff] %v484_v60 }
 0x157   :  { %553 = vst [vmem:[#allocation2 + $0x1a8] sm:$0xff] %v325_v61  ;;  %v328_v1 = vpop.f32.mrb[28].mxu0  ;;  %555 = vst [vmem:[#allocation2 + $0x1b8] sm:$0xff] %v486_v63  ;;  %v489_v3 = vpop.f32.mrb[28].mxu1 }
 0x158   :  { %v329_v2 = vadd.f32 %v328_v1, %v1264_v9  ;;  %v330_v4 = vpop.f32.mrb[29].mxu0  ;;  %v490_v5 = vadd.f32 %v489_v3, %v1266_v10  ;;  %v491_v7 = vpop.f32.mrb[29].mxu1 }
 0x159   :  { %v331_v6 = vadd.f32 %v330_v4, %v1268_v11  ;;  %v492_v8 = vadd.f32 %v491_v7, %v1270_v0 }
 0x15a   :  { %556 = vst [vmem:[#allocation2 + $0x1c0] sm:$0xff] %v329_v2  ;;  %558 = vst [vmem:[#allocation2 + $0x1d0] sm:$0xff] %v490_v5 }
 0x15b   :  { %557 = vst [vmem:[#allocation2 + $0x1c8] sm:$0xff] %v331_v6  ;;  %v334_v12 = vpop.f32.mrb[30].mxu0  ;;  %559 = vst [vmem:[#allocation2 + $0x1d8] sm:$0xff] %v492_v8  ;;  %v495_v14 = vpop.f32.mrb[30].mxu1 }
 0x15c   :  { %v335_v13 = vadd.f32 %v334_v12, %v1264_v9  ;;  %v336_v15 = vpop.f32.mrb[31].mxu0  ;;  %v496_v16 = vadd.f32 %v495_v14, %v1266_v10  ;;  %v497_v18 = vpop.f32.mrb[31].mxu1 }
 0x15d   :  { %v337_v17 = vadd.f32 %v336_v15, %v1268_v11  ;;  %v498_v19 = vadd.f32 %v497_v18, %v1270_v0 }
 0x15e   :  { %560 = vst [vmem:[#allocation2 + $0x1e0] sm:$0xff] %v335_v13  ;;  %562 = vst [vmem:[#allocation2 + $0x1f0] sm:$0xff] %v496_v16 }
 0x15f   :  { %561 = vst [vmem:[#allocation2 + $0x1e8] sm:$0xff] %v337_v17  ;;  %563 = vst [vmem:[#allocation2 + $0x1f8] sm:$0xff] %v498_v19 }
 0x160 LB: > { %v581_v9 = vld [vmem:[#allocation10 + $0x8] sm:$0xff]  ;;  %v580_v21 = vld [vmem:[#allocation10] sm:$0xff]  ;;  %v1123_v24 = vmov 0.0   ;;  %v583_v35 = vld [vmem:[#allocation10 + $0x18] sm:$0xff]  ;;  %s882_s26 = sshll.u32 %s1113_s3, 5  ;;  %s881_s30 = sshll.u32 %s1113_s3, 3  ;;  %s1113_s3 = sphi %s1336_s3, %s571_s3  }
 0x161   : > { %v585_v20 = vld [vmem:[#allocation10 + $0x28] sm:$0xff]  ;;  %v584_v22 = vld [vmem:[#allocation10 + $0x20] sm:$0xff]  ;;  %708 = vmatprep.mubr.f32.mxu0 %v1123_v24  ;;  %779 = vmatprep.mubr.f32.mxu1 %v1123_v24  ;;  %v587_v36 = vld [vmem:[#allocation10 + $0x38] sm:$0xff]  ;;  %s574_s29 = scalar_lea.vmem [#allocation2], %s882_s26  ;;  %s818_s5 = scalar_lea.vmem [#allocation11], %s881_s30 }
 0x162   : > { %v915_v10 = vpack.c.bf16 %v585_v20, %v581_v9  ;;  %v589_v11 = vld [vmem:[#allocation10 + $0x48] sm:$0xff]  ;;  %v917_v0 = vpack.c.bf16 %v584_v22, %v580_v21  ;;  %v588_v26 = vld [vmem:[#allocation10 + $0x40] sm:$0xff]  ;;  %v947_v38 = vpack.c.bf16 %v587_v36, %v583_v35  ;;  %v582_v39 = vld [vmem:[#allocation10 + $0x10] sm:$0xff]  ;;  %s571_s3 = sadd.s32 1, %s1113_s3  }
 0x163   : > { %v593_v23 = vld [vmem:[#allocation10 + $0x68] sm:$0xff]  ;;  %v592_v27 = vld [vmem:[#allocation10 + $0x60] sm:$0xff]  ;;  %v586_v40 = vld [vmem:[#allocation10 + $0x30] sm:$0xff]  ;;  %p568_p10 = scmp.ge.s32.totalorder %s571_s3, 16  }
 0x164   : > { %v919_v25 = vpack.c.bf16 %v593_v23, %v589_v11  ;;  %v597_v28 = vld [vmem:[#allocation10 + $0x88] sm:$0xff]  ;;  %916 = vmatprep.subr.bf16.mxu0 %v915_v10  ;;  %v921_v30 = vpack.c.bf16 %v592_v27, %v588_v26  ;;  %v596_v31 = vld [vmem:[#allocation10 + $0x80] sm:$0xff]  ;;  %v949_v41 = vpack.c.bf16 %v586_v40, %v582_v39  ;;  %948 = vmatprep.subr.bf16.mxu1 %v947_v38  ;;  %v591_v43 = vld [vmem:[#allocation10 + $0x58] sm:$0xff]  ;;  %s1124_s6 = smov (%p568_p10), [#allocation11]  }
 0x165   : > { %v601_v29 = vld [vmem:[#allocation10 + $0xa8] sm:$0xff]  ;;  %918 = vmatpush1.bf16.msra.mxu0 %v917_v0  ;;  %v600_v32 = vld [vmem:[#allocation10 + $0xa0] sm:$0xff]  ;;  %v595_v44 = vld [vmem:[#allocation10 + $0x78] sm:$0xff]  ;;  %s825_s7 = sshll.u32 (%p568_p10), %s1124_s6, 4  ;;  %s826_s7 = int_to_ptr.vmem [resolvable:$true] %s825_s7 }
 0x166   : > { %920 = vmatprep.subr.bf16.mxu0 %v919_v25  ;;  %v923_v33 = vpack.c.bf16 %v601_v29, %v597_v28  ;;  %v605_v34 = vld [vmem:[#allocation10 + $0xc8] sm:$0xff]  ;;  %v925_v42 = vpack.c.bf16 %v600_v32, %v596_v31  ;;  %v590_v45 = vld [vmem:[#allocation10 + $0x50] sm:$0xff]  ;;  %v604_v47 = vld [vmem:[#allocation10 + $0xc0] sm:$0xff]  ;;  %950 = vmatpush1.bf16.msra.mxu1 %v949_v41  ;;  %v951_v49 = vpack.c.bf16 %v595_v44, %v591_v43  ;;  %s1079_s8 = scalar_lea.vmem (%p568_p10), %s826_s7, 2048  ;;  %p1084_p12 = scmp.lt.s32.totalorder (%p568_p10), %s826_s7, %s826_s7 }
 0x167   : > { %v609_v37 = vld [vmem:[#allocation10 + $0xe8] sm:$0xff]  ;;  %v608_v48 = vld [vmem:[#allocation10 + $0xe0] sm:$0xff]  ;;  %v594_v50 = vld [vmem:[#allocation10 + $0x70] sm:$0xff]  ;;  %p1080_p11 = scmp.ne.s32.totalorder (%p568_p10), %s826_s7, %s1079_s8  ;;  %p1085_p13 = scmp.lt.s32.totalorder (%p568_p10), %s1079_s8, %s1079_s8 }
 0x168   : > { %v927_v46 = vpack.c.bf16 %v609_v37, %v605_v34  ;;  %v613_v51 = vld [vmem:[#allocation10 + $0x108] sm:$0xff]  ;;  %v953_v53 = vpack.c.bf16 %v594_v50, %v590_v45  ;;  %v599_v54 = vld [vmem:[#allocation10 + $0x98] sm:$0xff]  ;;  %952 = vmatprep.subr.bf16.mxu1 %v951_v49  ;;  %v598_v56 = vld [vmem:[#allocation10 + $0x90] sm:$0xff]  ;;  %v929_v58 = vpack.c.bf16 %v608_v48, %v604_v47 }
 0x169   : > { %922 = vmatpush1.bf16.msra.mxu0 %v921_v30  ;;  %v617_v52 = vld [vmem:[#allocation10 + $0x128] sm:$0xff]  ;;  %v603_v55 = vld [vmem:[#allocation10 + $0xb8] sm:$0xff]  ;;  %v602_v57 = vld [vmem:[#allocation10 + $0xb0] sm:$0xff]  ;;  %p1086_p0 = por (%p568_p10), %p1085_p13, %p1084_p12 }
 0x16a   : > { %924 = vmatprep.subr.bf16.mxu0 %v923_v33  ;;  %v612_v59 = vld [vmem:[#allocation10 + $0x100] sm:$0xff]  ;;  %v955_v61 = vpack.c.bf16 %v603_v55, %v599_v54  ;;  %v931_v62 = vpack.c.bf16 %v617_v52, %v613_v51  ;;  %954 = vmatpush1.bf16.msra.mxu1 %v953_v53  ;;  %v621_v63 = vld [vmem:[#allocation10 + $0x148] sm:$0xff]  ;;  %v957_v1 = vpack.c.bf16 %v602_v57, %v598_v56  ;;  %v607_v2 = vld [vmem:[#allocation10 + $0xd8] sm:$0xff] }
 0x16b   : > { %v616_v60 = vld [vmem:[#allocation10 + $0x120] sm:$0xff]  ;;  %v611_v3 = vld [vmem:[#allocation10 + $0xf8] sm:$0xff]  ;;  %v625_v4 = vld [vmem:[#allocation10 + $0x168] sm:$0xff]  ;;  %p1087_p1 = pnand (%p568_p10), %p1086_p0, %p1080_p11 }
 0x16c   : > { %956 = vmatprep.subr.bf16.mxu1 %v955_v61  ;;  %v959_v5 = vpack.c.bf16 %v611_v3, %v607_v2  ;;  %v606_v6 = vld [vmem:[#allocation10 + $0xd0] sm:$0xff]  ;;  %v933_v8 = vpack.c.bf16 %v616_v60, %v612_v59  ;;  %v615_v12 = vld [vmem:[#allocation10 + $0x118] sm:$0xff]  ;;  %v935_v14 = vpack.c.bf16 %v625_v4, %v621_v63  ;;  %v620_v15 = vld [vmem:[#allocation10 + $0x140] sm:$0xff] }
 0x16d   : > { %926 = vmatpush1.bf16.msra.mxu0 %v925_v42  ;;  %v610_v7 = vld [vmem:[#allocation10 + $0xf0] sm:$0xff]  ;;  %v619_v13 = vld [vmem:[#allocation10 + $0x138] sm:$0xff]  ;;  %v624_v16 = vld [vmem:[#allocation10 + $0x160] sm:$0xff] }
 0x16e   : > { %928 = vmatprep.subr.bf16.mxu0 %v927_v46  ;;  %958 = vmatpush1.bf16.msra.mxu1 %v957_v1  ;;  %v629_v17 = vld [vmem:[#allocation10 + $0x188] sm:$0xff]  ;;  %v961_v18 = vpack.c.bf16 %v610_v7, %v606_v6  ;;  %v963_v9 = vpack.c.bf16 %v619_v13, %v615_v12  ;;  %v614_v20 = vld [vmem:[#allocation10 + $0x110] sm:$0xff]  ;;  %v623_v10 = vld [vmem:[#allocation10 + $0x158] sm:$0xff]  ;;  %v937_v11 = vpack.c.bf16 %v624_v16, %v620_v15 }
 0x16f   : > { %v633_v19 = vld [vmem:[#allocation10 + $0x1a8] sm:$0xff]  ;;  %960 = vmatprep.subr.bf16.mxu1 %v959_v5  ;;  %v618_v21 = vld [vmem:[#allocation10 + $0x130] sm:$0xff]  ;;  %v627_v22 = vld [vmem:[#allocation10 + $0x178] sm:$0xff] }
 0x170   : > { %v939_v23 = vpack.c.bf16 %v633_v19, %v629_v17  ;;  %v628_v24 = vld [vmem:[#allocation10 + $0x180] sm:$0xff]  ;;  %v637_v25 = vld [vmem:[#allocation10 + $0x1c8] sm:$0xff]  ;;  %v965_v26 = vpack.c.bf16 %v618_v21, %v614_v20  ;;  %v967_v28 = vpack.c.bf16 %v627_v22, %v623_v10  ;;  %v622_v29 = vld [vmem:[#allocation10 + $0x150] sm:$0xff] }
 0x171   : > { %930 = vmatpush1.bf16.msra.mxu0 %v929_v58  ;;  %v632_v0 = vld [vmem:[#allocation10 + $0x1a0] sm:$0xff]  ;;  %v641_v27 = vld [vmem:[#allocation10 + $0x1e8] sm:$0xff]  ;;  %v626_v30 = vld [vmem:[#allocation10 + $0x170] sm:$0xff] }
 0x172   : > { %932 = vmatprep.subr.bf16.mxu0 %v931_v62  ;;  %962 = vmatpush1.bf16.msra.mxu1 %v961_v18  ;;  %v631_v31 = vld [vmem:[#allocation10 + $0x198] sm:$0xff]  ;;  %v941_v33 = vpack.c.bf16 %v632_v0, %v628_v24  ;;  %v943_v34 = vpack.c.bf16 %v641_v27, %v637_v25  ;;  %v636_v35 = vld [vmem:[#allocation10 + $0x1c0] sm:$0xff]  ;;  %v969_v37 = vpack.c.bf16 %v626_v30, %v622_v29  ;;  %v630_v39 = vld [vmem:[#allocation10 + $0x190] sm:$0xff] }
 0x173   : > { %964 = vmatprep.subr.bf16.mxu1 %v963_v9  ;;  %v635_v32 = vld [vmem:[#allocation10 + $0x1b8] sm:$0xff]  ;;  %v640_v36 = vld [vmem:[#allocation10 + $0x1e0] sm:$0xff]  ;;  %v634_v40 = vld [vmem:[#allocation10 + $0x1b0] sm:$0xff] }
 0x174   : > { %v971_v38 = vpack.c.bf16 %v635_v32, %v631_v31  ;;  %v639_v41 = vld [vmem:[#allocation10 + $0x1d8] sm:$0xff]  ;;  %v945_v43 = vpack.c.bf16 %v640_v36, %v636_v35  ;;  %v973_v44 = vpack.c.bf16 %v634_v40, %v630_v39  ;;  %v638_v46 = vld [vmem:[#allocation10 + $0x1d0] sm:$0xff]  ;;  %v578_v58 = vld [vmem:[%s574_s29 + $0x18] sm:$0xff] }
 0x175   : > { %934 = vmatpush1.bf16.msra.mxu0 %v933_v8  ;;  %v643_v42 = vld [vmem:[#allocation10 + $0x1f8] sm:$0xff]  ;;  %v642_v47 = vld [vmem:[#allocation10 + $0x1f0] sm:$0xff]  ;;  %v577_v2 = vld [vmem:[%s574_s29 + $0x10] sm:$0xff] }
 0x176   : > { %936 = vmatprep.subr.bf16.mxu0 %v935_v14  ;;  %966 = vmatpush1.bf16.msra.mxu1 %v965_v26  ;;  %v975_v45 = vpack.c.bf16 %v643_v42, %v639_v41  ;;  %v579_v48 = vld [vmem:[#allocation3] sm:$0xff]  ;;  %v977_v49 = vpack.c.bf16 %v642_v47, %v638_v46  ;;  %v576_v51 = vld [vmem:[%s574_s29 + $0x8] sm:$0xff] }
 0x177   : > { %968 = vmatprep.subr.bf16.mxu1 %v967_v28  ;;  %v575_v50 = vld [vmem:[%s574_s29] sm:$0xff]  ;;  %v809_v14 = vld [vmem:[#allocation4] sm:$0xff] }
 0x179   : > { %938 = vmatpush1.bf16.msra.mxu0 %v937_v11 }
 0x17a   : > { %940 = vmatprep.subr.bf16.mxu0 %v939_v23  ;;  %970 = vmatpush1.bf16.msra.mxu1 %v969_v37 }
 0x17b   : > { %972 = vmatprep.subr.bf16.mxu1 %v971_v38 }
 0x17d   : > { %942 = vmatpush1.bf16.msra.mxu0 %v941_v33 }
 0x17e   : > { %944 = vmatprep.subr.bf16.mxu0 %v943_v34  ;;  %974 = vmatpush1.bf16.msra.mxu1 %v973_v44 }
 0x17f   : > { %976 = vmatprep.subr.bf16.mxu1 %v975_v45 }
 0x181   : > { %946 = vmatpush1.bf16.msra.mxu0 %v945_v43 }
 0x182   : > { %978 = vmatpush1.bf16.msra.mxu1 %v977_v49 }
 0x184   : > { %709 = vmatmul.mubr.f32.vlgmr.msra.gmra.mrb[0].mxu0 %v579_v48 }
 0x185   : > { %780 = vmatmul.mubr.f32.vlgmr.msra.gmra.mrb[0].mxu1 %v579_v48 }
 0x257   : > { %v710_v52 = vpop.f32.mrb[0].mxu0 }
 0x258   : > { %v786_v53 = vadd.f32 %v710_v52, %v575_v50  ;;  %v712_v54 = vpop.f32.mrb[1].mxu0  ;;  %v781_v60 = vpop.f32.mrb[0].mxu1 }
 0x259   : > { %v787_v55 = vadd.f32 %v712_v54, %v576_v51  ;;  %v783_v62 = vpop.f32.mrb[1].mxu1  ;;  %v788_v4 = vadd.f32 %v781_v60, %v577_v2 }
 0x25a   : > { %v790_v56 = vsub.f32 0.0, %v786_v53  ;;  %v789_v63 = vadd.f32 %v783_v62, %v578_v58 }
 0x25b   : > { %v796_v57 = vsub.f32 0.0, %v787_v55 }
 0x25c   : > { %v791_v59 = vmul.f32 1.442695, %v790_v56  ;;  %v803_v1 = vsub.f32 0.0, %v789_v63 }
 0x25d   : > { %v797_v61 = vmul.f32 1.442695, %v796_v57 }
 0x25e   : > { %997 = vpow2.f32 %v791_v59  ;;  %v804_v3 = vmul.f32 1.442695, %v803_v1 }
 0x25f   : > { %999 = vpow2.f32 %v797_v61 }
 0x260   : > { %1001 = vpow2.f32 %v804_v3 }
 0x261   : > { %1003 = vtanh.f32 %v788_v4 }
 0x268   : > { %v998_v5 = vpop.eup %997 }
 0x269   : > { %v1000_v6 = vpop.eup %999  ;;  %v793_v7 = vadd.f32 1.0, %v998_v5 }
 0x26a   : > { %v799_v8 = vadd.f32 1.0, %v1000_v6  ;;  %v1002_v12 = vpop.eup %1001 }
 0x26b   : > { %1005 = vrcp.f32 %v793_v7  ;;  %v1004_v13 = vpop.eup %1003  ;;  %v806_v16 = vadd.f32 1.0, %v1002_v12 }
 0x26c   : > { %1007 = vrcp.f32 %v799_v8 }
 0x26d   : > { %1009 = vrcp.f32 %v806_v16 }
 0x275   : > { %v1006_v15 = vpop.eup %1005 }
 0x276   : > { %v1008_v17 = vpop.eup %1007  ;;  %v811_v18 = vmul.f32 %v1006_v15, %v1004_v13 }
 0x277   : > { %v810_v19 = vmul.f32 %v1008_v17, %v809_v14  ;;  %v1010_v20 = vpop.eup %1009 }
 0x279   : > { %v812_v9 = vadd.f32 %v811_v18, %v810_v19 }
 0x27b   : > { %1011 = vtanh.f32 %v812_v9  ;;  %815 = vst [vmem:[#allocation4] sm:$0xff] %v812_v9 }
 0x282   :  { %570 = sbr.rel (!%p568_p10) target bundleno = 352 (0x160), region = 57 }
 0x285   : > { %v1012_v21 = vpop.eup %1011 }
 0x286   : > { %v814_v10 = vmul.f32 %v1012_v21, %v1010_v20 }
 0x288   : > { %816 = vst [vmem:[#allocation3] sm:$0xff] %v814_v10  ;;  %819 = vst [vmem:[%s818_s5] sm:$0xff] %v814_v10 }
 0x289   :  { %1090 = shalt.err (!%p1087_p1)
}
 0x28a   :  { %s1091_s11 = scalar_lea.hbm %s1365_s4, 2048 }
 0x28b   :  { %p1092_p2 = scmp.ne.s32.totalorder %s1365_s4, %s1091_s11  ;;  %p1095_p3 = scmp.lt.u32.totalorder %s1091_s11, %s1365_s4 }
 0x28d   :  { %p1097_p4 = pnand %p1095_p3, %p1092_p2 }
 0x28f   :  { %1100 = shalt.err (!%p1097_p4)
}
 0x290   :  { %831 = dma.vmem_to_hbm [thread:$0]  %s826_s7, 2048, %s1365_s4, [#allocation7], %s1119_s1, %s1119_s1, %s1120_s13  }
 0x291   :  { %1109 = dma.done.wait [#allocation7], 2048  }
 0x292   :  { %1110 = vsyncadd [#allocation7], 4294965248 }
 0x293   :  { %835 = vsyncpa [#allocation6], 1 }
 0x294   :  { %836 = vsyncpa [#allocation9], 1 }
 0x295   :  { %837 = vsyncpa [#allocation7], 1 }

</bundles_post_ra>
